<compile_context>
chip_gen: v6e
topology: v6e:2x2x1
jax: 0.10.0
libtpu: 0.0.40
codegen_flags: <defaults>
</compile_context>

<pallas_src>
import math
from functools import partial

import jax
import jax.numpy as jnp
from jax.experimental import pallas as pl
from jax.experimental.pallas import tpu as pltpu

IGNORE_INDEX = 255


def _round_up(x, m):
    return ((x + m - 1) // m) * m


# --------------------------------------------------------------------------------------
# Kernel 1: softmax over classes + per-class negated errors / foreground (one lane tile)
# --------------------------------------------------------------------------------------
def _softmax_err_kernel(logits_ref, tgt_ref, neg_err_ref, fg_ref):
    x = logits_ref[...].astype(jnp.float32)                  # (C, TN)
    x = x - jnp.max(x, axis=0, keepdims=True)
    e = jnp.exp(x)
    inv = 1.0 / jnp.sum(e, axis=0, keepdims=True)            # (1, TN) exact reciprocal
    p = e * inv                                               # softmax probs (C, TN)

    tgt = tgt_ref[...]                                        # (1, TN) int32
    c, tn = p.shape
    valid = tgt != IGNORE_INDEX                               # (1, TN)
    cls = jax.lax.broadcasted_iota(jnp.int32, (c, tn), 0)     # class id per sublane row
    fg = jnp.where((tgt == cls) & valid, 1.0, 0.0)            # (C, TN) foreground

    # Store -err so the wrapper can feed lax.sort (ascending) directly with no extra
    # full-array negate passes. Invalid/padded pixels get exactly 0.0 -> sort to tail.
    neg_err_ref[...] = jnp.where(valid, -jnp.abs(fg - p), 0.0)
    fg_ref[...] = fg.astype(jnp.bfloat16)                     # exact for {0,1}


# --------------------------------------------------------------------------------------
# Kernel 2: blocked Lovasz extension with cross-tile carries
# --------------------------------------------------------------------------------------
def _lane_inclusive_cumsum(x, lane):
    """Inclusive prefix sum along lanes via log2(TN) roll + masked-add steps.

    Replaces the O(N^2) lower-triangular matmul. Rolls with shift >= 128 move whole
    vregs (no lane rotation), so XLU cost is bounded by the 7 sub-128 steps.
    """
    tn = x.shape[-1]
    shift = 1
    while shift < tn:
        rolled = pltpu.roll(x, shift=shift, axis=1)           # rolled[:, j] = x[:, j-shift]
        x = x + jnp.where(lane >= shift, rolled, 0.0)
        shift *= 2
    return x


def _lovasz_kernel(neg_err_ref, fg_ref, gts_ref, out_ref,
                   carry_ref, prevjac_ref, loss_ref):
    i = pl.program_id(0)
    n_tiles = pl.num_programs(0)

    @pl.when(i == 0)
    def _():
        carry_ref[...] = jnp.zeros_like(carry_ref)            # running sum(fg) prefix
        prevjac_ref[...] = jnp.zeros_like(prevjac_ref)        # jaccard at previous position
        loss_ref[...] = jnp.zeros_like(loss_ref)               # per-class loss accumulator

    err = -neg_err_ref[...]                                    # (C, TN) sorted descending
    fg = fg_ref[...].astype(jnp.float32)                       # (C, TN) same permutation
    gts = gts_ref[...]                                         # (C, 1)
    c, tn = err.shape

    lane = jax.lax.broadcasted_iota(jnp.int32, (c, tn), 1)

    cum_fg = _lane_inclusive_cumsum(fg, lane) + carry_ref[...]  # global cumsum(fg)
    # TODO(synk): pos/cum_fg are f32; integer exactness is lost above ~2^24 valid pixels.
    pos = (lane + i * tn + 1).astype(jnp.float32)               # global 1-based index
    union = gts + (pos - cum_fg)                                # gts + cumsum(1 - fg)
    jaccard = pos / union                                       # == 1 - (gts - cum_fg)/union

    # lovasz_grad: g[k] = jaccard[k] - jaccard[k-1]; boundary value carried across tiles
    prev = pltpu.roll(jaccard, shift=1, axis=1)
    prev = jnp.where(lane == 0, prevjac_ref[...], prev)
    grad = jaccard - prev

    loss_ref[...] += jnp.sum(err * grad, axis=1, keepdims=True)  # (C, 1)
    carry_ref[...] = cum_fg[:, tn - 1:tn]
    prevjac_ref[...] = jaccard[:, tn - 1:tn]

    @pl.when(i == n_tiles - 1)
    def _():
        present = (gts > 0.0).astype(jnp.float32)                # classes='present'
        num = jnp.sum(present * loss_ref[...], axis=(0, 1), keepdims=True)   # (1, 1)
        den = jnp.sum(present, axis=(0, 1), keepdims=True)                   # (1, 1)
        out_ref[...] = jnp.where(den > 0.0, num / den, jnp.zeros_like(num))


# --------------------------------------------------------------------------------------
# Wrapper
# --------------------------------------------------------------------------------------
@partial(jax.jit, static_argnames=("tn_softmax", "tn_lovasz"))
def lovasz_softmax_loss(logits, targets, *, tn_softmax=4096, tn_lovasz=4096):
    """Forward of LovaszSoftmax(ignore_index=255, per_image=False).

    tn_softmax / tn_lovasz are lane-tile widths (multiples of 128).  Large defaults
    amortize the ~0.35us per-grid-step cost; double-buffered working sets stay well
    under the 32 MiB VMEM limit on every TPU generation (incl. v7x's 64 MiB VMEM).
    """
    assert tn_softmax % 128 == 0 and tn_lovasz % 128 == 0

    B, C, H, W = logits.shape
    N = B * H * W
    n_pad = _round_up(N, math.lcm(tn_softmax, tn_lovasz))

    logits_cn = jnp.transpose(logits, (1, 0, 2, 3)).reshape(C, N).astype(jnp.float32)
    logits_cn = jnp.pad(logits_cn, ((0, 0), (0, n_pad - N)))          # padded pixels ignored
    tgt_1n = targets.reshape(1, N).astype(jnp.int32)
    tgt_1n = jnp.pad(tgt_1n, ((0, 0), (0, n_pad - N)), constant_values=IGNORE_INDEX)

    # ---- kernel 1: softmax + (negated) errors, tiled & fully parallel over N ----
    grid1 = (n_pad // tn_softmax,)
    neg_err, fg = pl.pallas_call(
        _softmax_err_kernel,
        out_shape=(jax.ShapeDtypeStruct((C, n_pad), jnp.float32),
                   jax.ShapeDtypeStruct((C, n_pad), jnp.bfloat16)),
        grid=grid1,
        in_specs=[pl.BlockSpec((C, tn_softmax), lambda i: (0, i)),
                  pl.BlockSpec((1, tn_softmax), lambda i: (0, i))],
        out_specs=(pl.BlockSpec((C, tn_softmax), lambda i: (0, i)),
                   pl.BlockSpec((C, tn_softmax), lambda i: (0, i))),
        compiler_params=pltpu.CompilerParams(
            dimension_semantics=("parallel",),
            vmem_limit_bytes=32 * 1024 * 1024),
    )(logits_cn, tgt_1n)

    # Per-class valid foreground counts, computed directly from targets (cheap fused
    # int32 reduce) so kernel 1 keeps a purely "parallel" grid axis (no accumulator).
    cls_ids = jnp.arange(C, dtype=jnp.int32)[:, None]                     # (C, 1)
    valid = tgt_1n != IGNORE_INDEX                                        # (1, Np)
    gts = jnp.sum(jnp.where((tgt_1n == cls_ids) & valid, 1.0, 0.0),
                  axis=1, keepdims=True).astype(jnp.float32)              # (C, 1)

    # TODO(synk): descending sort (torch.sort) has no Mosaic/Pallas lowering; done with
    # a single multi-operand lax.sort (ascending on -err, carrying bf16 fg) instead of
    # argsort + gathers. Keys were written negated by kernel 1, so no extra negate pass.
    neg_err_sorted, fg_sorted = jax.lax.sort((neg_err, fg), dimension=1, num_keys=1)

    # ---- kernel 2: blocked Lovasz extension over N with VMEM carries ----
    grid2 = (n_pad // tn_lovasz,)
    log_steps = max(1, int(math.ceil(math.log2(tn_lovasz))))
    cost2 = pl.CostEstimate(
        flops=int(C * n_pad * (3 * log_steps + 10)),
        transcendentals=0,
        bytes_accessed=int(C * n_pad * (4 + 2) + C * 4 + 4))

    loss = pl.pallas_call(
        _lovasz_kernel,
        out_shape=jax.ShapeDtypeStruct((1, 1), jnp.float32),
        grid=grid2,
        in_specs=[pl.BlockSpec((C, tn_lovasz), lambda i: (0, i)),
                  pl.BlockSpec((C, tn_lovasz), lambda i: (0, i)),
                  pl.BlockSpec((C, 1), lambda i: (0, 0))],
        out_specs=pl.BlockSpec((1, 1), lambda i: (0, 0)),
        scratch_shapes=[pltpu.VMEM((C, 1), jnp.float32),   # cum_fg carry
                        pltpu.VMEM((C, 1), jnp.float32),   # previous jaccard
                        pltpu.VMEM((C, 1), jnp.float32)],  # per-class loss acc
        compiler_params=pltpu.CompilerParams(
            dimension_semantics=("arbitrary",),            # carried reduction axis
            vmem_limit_bytes=32 * 1024 * 1024),
        cost_estimate=cost2,
    )(neg_err_sorted, fg_sorted, gts)
    return loss[0, 0]


# --------------------------------------------------------------------------------------
# Pure-JAX reference (Berman lovasz_softmax, classes='present', per_image=False)
# --------------------------------------------------------------------------------------
def _lovasz_softmax_ref(logits, targets, ignore_index=IGNORE_INDEX):
    B, C, H, W = logits.shape
    probas = jax.nn.softmax(logits, axis=1)
    probas = jnp.transpose(probas, (0, 2, 3, 1)).reshape(-1, C)   # (N, C)
    labels = targets.reshape(-1)
    valid = labels != ignore_index
    losses, present = [], []
    for c in range(C):
        fg = jnp.where(valid, (labels == c).astype(jnp.float32), 0.0)
        errors = jnp.where(valid, jnp.abs(fg - probas[:, c]), 0.0)
        order = jnp.argsort(-errors)
        errors_sorted = errors[order]
        fg_sorted = fg[order]
        gts = jnp.sum(fg)
        cum = jnp.cumsum(fg_sorted)
        intersection = gts - cum
        union = gts + jnp.cumsum(1.0 - fg_sorted)
        jaccard = 1.0 - intersection / union
        g = jnp.concatenate([jaccard[:1], jaccard[1:] - jaccard[:-1]])
        losses.append(jnp.dot(errors_sorted, g))
        present.append((gts > 0).astype(jnp.float32))
    losses = jnp.stack(losses)
    present = jnp.stack(present)
    den = jnp.sum(present)
    return jnp.where(den > 0, jnp.sum(losses * present) / den, 0.0)


if __name__ == "__main__":
    key = jax.random.PRNGKey(0)
    k1, k2, k3 = jax.random.split(key, 3)
    B, C, H, W = 2, 4, 16, 16
    logits = jax.random.normal(k1, (B, C, H, W), jnp.float32)
    targets = jax.random.randint(k2, (B, H, W), 0, C, dtype=jnp.int32)
    ignore_mask = jax.random.uniform(k3, (B, H, W)) < 0.1
    targets = jnp.where(ignore_mask, IGNORE_INDEX, targets)

    ref = _lovasz_softmax_ref(logits, targets)

    # Small tiles to exercise the multi-tile carry / prefix path, plus default tiles.
    loss_tiled = jax.block_until_ready(
        lovasz_softmax_loss(logits, targets, tn_softmax=128, tn_lovasz=128))
    loss_default = jax.block_until_ready(lovasz_softmax_loss(logits, targets))

    for name, loss in (("tiled", loss_tiled), ("default", loss_default)):
        assert jnp.isfinite(loss), ("non-finite loss", name, loss)
        assert jnp.allclose(loss, ref, rtol=1e-3, atol=1e-3), (name, loss, ref)
    print("KERNEL_OK")
</pallas_src>

<mosaic_0001>
module attributes {stable_mosaic.version = 11 : i64} {
  func.func @_softmax_err_kernel(%arg0: i32, %arg1: memref<4x128xf32, #tpu.memory_space<vmem>>, %arg2: memref<1x128xi32, #tpu.memory_space<vmem>>, %arg3: memref<4x128xf32, #tpu.memory_space<vmem>>, %arg4: memref<4x128xbf16, #tpu.memory_space<vmem>>) attributes {dimension_semantics = [#tpu.dimension_semantics<parallel>], iteration_bounds = array<i64: 4>, scalar_prefetch = 0 : i64, scratch_operands = 0 : i64, tpu.core_type = #tpu.core_type<tc>, window_params = [{transform_indices = @transform_0, window_bounds = array<i64: 4, 128>}, {transform_indices = @transform_1, window_bounds = array<i64: 1, 128>}, {transform_indices = @transform_2, window_bounds = array<i64: 4, 128>}, {transform_indices = @transform_3, window_bounds = array<i64: 4, 128>}]} {
    %c0 = arith.constant 0 : index
    %c0_0 = arith.constant 0 : index
    %0 = vector.load %arg1[%c0, %c0_0] : memref<4x128xf32, #tpu.memory_space<vmem>>, vector<4x128xf32>
    %cst = arith.constant dense<0xFF800000> : vector<128xf32>
    %1 = vector.multi_reduction <maximumf>, %0, %cst [0] : vector<4x128xf32> to vector<128xf32>
    %2 = vector.shape_cast %1 : vector<128xf32> to vector<1x128xf32>
    %3 = vector.broadcast %2 : vector<1x128xf32> to vector<4x128xf32>
    %4 = arith.subf %0, %3 : vector<4x128xf32>
    %5 = math.exp %4 : vector<4x128xf32>
    %cst_1 = arith.constant dense<0.000000e+00> : vector<128xf32>
    %6 = vector.multi_reduction <add>, %5, %cst_1 [0] : vector<4x128xf32> to vector<128xf32>
    %7 = vector.shape_cast %6 : vector<128xf32> to vector<1x128xf32>
    %cst_2 = arith.constant 1.000000e+00 : f32
    %8 = vector.broadcast %cst_2 : f32 to vector<1x128xf32>
    %9 = arith.divf %8, %7 : vector<1x128xf32>
    %10 = vector.broadcast %9 : vector<1x128xf32> to vector<4x128xf32>
    %11 = arith.mulf %5, %10 : vector<4x128xf32>
    %c0_3 = arith.constant 0 : index
    %c0_4 = arith.constant 0 : index
    %12 = vector.load %arg2[%c0_3, %c0_4] : memref<1x128xi32, #tpu.memory_space<vmem>>, vector<1x128xi32>
    %c255_i32 = arith.constant 255 : i32
    %13 = vector.broadcast %c255_i32 : i32 to vector<1x128xi32>
    %14 = arith.cmpi ne, %12, %13 : vector<1x128xi32>
    %15 = tpu.iota {dimensions = array<i32: 0>} : vector<4x128xi32>
    %16 = vector.broadcast %12 : vector<1x128xi32> to vector<4x128xi32>
    %17 = arith.cmpi eq, %16, %15 : vector<4x128xi32>
    %18 = vector.broadcast %14 : vector<1x128xi1> to vector<4x128xi1>
    %19 = arith.andi %17, %18 : vector<4x128xi1>
    %cst_5 = arith.constant 1.000000e+00 : f32
    %cst_6 = arith.constant 0.000000e+00 : f32
    %20 = vector.broadcast %cst_5 : f32 to vector<4x128xf32>
    %21 = vector.broadcast %cst_6 : f32 to vector<4x128xf32>
    %22 = arith.select %19, %20, %21 : vector<4x128xi1>, vector<4x128xf32>
    %23 = arith.subf %22, %11 : vector<4x128xf32>
    %24 = math.absf %23 : vector<4x128xf32>
    %cst_7 = arith.constant 0.000000e+00 : f32
    %25 = vector.broadcast %cst_7 : f32 to vector<4x128xf32>
    %26 = arith.subf %25, %24 : vector<4x128xf32>
    %cst_8 = arith.constant 0.000000e+00 : f32
    %27 = vector.shape_cast %14 : vector<1x128xi1> to vector<1x128xi1>
    %28 = vector.broadcast %27 : vector<1x128xi1> to vector<4x128xi1>
    %29 = vector.broadcast %cst_8 : f32 to vector<4x128xf32>
    %30 = arith.select %28, %26, %29 : vector<4x128xi1>, vector<4x128xf32>
    %c0_9 = arith.constant 0 : index
    %c0_10 = arith.constant 0 : index
    %31 = vector.load %arg3[%c0_9, %c0_10] : memref<4x128xf32, #tpu.memory_space<vmem>>, vector<4x128xf32>
    tpu.vector_store %arg3[%c0_9, %c0_10], %30 {strides = array<i32>} : memref<4x128xf32, #tpu.memory_space<vmem>>, vector<4x128xf32>,
    %32 = arith.truncf %22 : vector<4x128xf32> to vector<4x128xbf16>
    %c0_11 = arith.constant 0 : index
    %c0_12 = arith.constant 0 : index
    %33 = vector.load %arg4[%c0_11, %c0_12] : memref<4x128xbf16, #tpu.memory_space<vmem>>, vector<4x128xbf16>
    tpu.vector_store %arg4[%c0_11, %c0_12], %32 {strides = array<i32>} : memref<4x128xbf16, #tpu.memory_space<vmem>>, vector<4x128xbf16>,
    return
  }
  func.func @transform_0(%arg0: i32) -> (i32, i32) {
    %c0_i32 = arith.constant 0 : i32
    %c0_i32_0 = arith.constant 0 : i32
    return %c0_i32, %arg0 : i32, i32
  }
  func.func @transform_1(%arg0: i32) -> (i32, i32) {
    %c0_i32 = arith.constant 0 : i32
    %c0_i32_0 = arith.constant 0 : i32
    return %c0_i32, %arg0 : i32, i32
  }
  func.func @transform_2(%arg0: i32) -> (i32, i32) {
    %c0_i32 = arith.constant 0 : i32
    %c0_i32_0 = arith.constant 0 : i32
    return %c0_i32, %arg0 : i32, i32
  }
  func.func @transform_3(%arg0: i32) -> (i32, i32) {
    %c0_i32 = arith.constant 0 : i32
    %c0_i32_0 = arith.constant 0 : i32
    return %c0_i32, %arg0 : i32, i32
  }
}

module attributes {stable_mosaic.version = 11 : i64} {
  func.func @_lovasz_kernel(%arg0: i32, %arg1: memref<4x128xf32, #tpu.memory_space<vmem>>, %arg2: memref<4x128xbf16, #tpu.memory_space<vmem>>, %arg3: memref<4x1xf32, #tpu.memory_space<vmem>>, %arg4: memref<1x1xf32, #tpu.memory_space<vmem>>, %arg5: memref<4x1xf32, #tpu.memory_space<vmem>>, %arg6: memref<4x1xf32, #tpu.memory_space<vmem>>, %arg7: memref<4x1xf32, #tpu.memory_space<vmem>>) attributes {dimension_semantics = [#tpu.dimension_semantics<arbitrary>], iteration_bounds = array<i64: 4>, scalar_prefetch = 0 : i64, scratch_operands = 3 : i64, tpu.core_type = #tpu.core_type<tc>, window_params = [{transform_indices = @transform_0, window_bounds = array<i64: 4, 128>}, {transform_indices = @transform_1, window_bounds = array<i64: 4, 128>}, {pipeline_mode = #tpu.pipeline_mode<synchronous>, transform_indices = @transform_2, window_bounds = array<i64: 4, 1>}, {pipeline_mode = #tpu.pipeline_mode<synchronous>, transform_indices = @transform_3, window_bounds = array<i64: 1, 1>}]} {
    %c0_i32 = arith.constant 0 : i32
    %0 = arith.cmpi eq, %arg0, %c0_i32 : i32
    %1 = arith.extui %0 : i1 to i32
    %c0_i32_0 = arith.constant 0 : i32
    %2 = arith.cmpi ne, %1, %c0_i32_0 : i32
    scf.if %2 {
      %cst_37 = arith.constant 0.000000e+00 : f32
      %86 = vector.broadcast %cst_37 : f32 to vector<4x1xf32>
      %c0_38 = arith.constant 0 : index
      %c0_39 = arith.constant 0 : index
      %87 = vector.load %arg5[%c0_38, %c0_39] : memref<4x1xf32, #tpu.memory_space<vmem>>, vector<4x1xf32>
      tpu.vector_store %arg5[%c0_38, %c0_39], %86 {strides = array<i32>} : memref<4x1xf32, #tpu.memory_space<vmem>>, vector<4x1xf32>,
      %cst_40 = arith.constant 0.000000e+00 : f32
      %88 = vector.broadcast %cst_40 : f32 to vector<4x1xf32>
      %c0_41 = arith.constant 0 : index
      %c0_42 = arith.constant 0 : index
      %89 = vector.load %arg6[%c0_41, %c0_42] : memref<4x1xf32, #tpu.memory_space<vmem>>, vector<4x1xf32>
      tpu.vector_store %arg6[%c0_41, %c0_42], %88 {strides = array<i32>} : memref<4x1xf32, #tpu.memory_space<vmem>>, vector<4x1xf32>,
      %cst_43 = arith.constant 0.000000e+00 : f32
      %90 = vector.broadcast %cst_43 : f32 to vector<4x1xf32>
      %c0_44 = arith.constant 0 : index
      %c0_45 = arith.constant 0 : index
      %91 = vector.load %arg7[%c0_44, %c0_45] : memref<4x1xf32, #tpu.memory_space<vmem>>, vector<4x1xf32>
      tpu.vector_store %arg7[%c0_44, %c0_45], %90 {strides = array<i32>} : memref<4x1xf32, #tpu.memory_space<vmem>>, vector<4x1xf32>,
    } else {
    }
    %c0 = arith.constant 0 : index
    %c0_1 = arith.constant 0 : index
    %3 = vector.load %arg1[%c0, %c0_1] : memref<4x128xf32, #tpu.memory_space<vmem>>, vector<4x128xf32>
    %cst = arith.constant 0.000000e+00 : f32
    %4 = vector.broadcast %cst : f32 to vector<4x128xf32>
    %5 = arith.subf %4, %3 : vector<4x128xf32>
    %c0_2 = arith.constant 0 : index
    %c0_3 = arith.constant 0 : index
    %6 = vector.load %arg2[%c0_2, %c0_3] : memref<4x128xbf16, #tpu.memory_space<vmem>>, vector<4x128xbf16>
    %7 = arith.extf %6 : vector<4x128xbf16> to vector<4x128xf32>
    %c0_4 = arith.constant 0 : index
    %c0_5 = arith.constant 0 : index
    %8 = vector.load %arg3[%c0_4, %c0_5] : memref<4x1xf32, #tpu.memory_space<vmem>>, vector<4x1xf32>
    %9 = tpu.iota {dimensions = array<i32: 1>} : vector<4x128xi32>
    %c1_i32 = arith.constant 1 : i32
    %10 = tpu.dynamic_rotate %7 by %c1_i32 dim 1 : vector<4x128xf32>, i32 -> vector<4x128xf32>
    %c1_i32_6 = arith.constant 1 : i32
    %11 = vector.broadcast %c1_i32_6 : i32 to vector<4x128xi32>
    %12 = arith.cmpi sge, %9, %11 : vector<4x128xi32>
    %cst_7 = arith.constant 0.000000e+00 : f32
    %13 = vector.broadcast %cst_7 : f32 to vector<4x128xf32>
    %14 = arith.select %12, %10, %13 : vector<4x128xi1>, vector<4x128xf32>
    %15 = arith.addf %7, %14 : vector<4x128xf32>
    %c2_i32 = arith.constant 2 : i32
    %16 = tpu.dynamic_rotate %15 by %c2_i32 dim 1 : vector<4x128xf32>, i32 -> vector<4x128xf32>
    %c2_i32_8 = arith.constant 2 : i32
    %17 = vector.broadcast %c2_i32_8 : i32 to vector<4x128xi32>
    %18 = arith.cmpi sge, %9, %17 : vector<4x128xi32>
    %cst_9 = arith.constant 0.000000e+00 : f32
    %19 = vector.broadcast %cst_9 : f32 to vector<4x128xf32>
    %20 = arith.select %18, %16, %19 : vector<4x128xi1>, vector<4x128xf32>
    %21 = arith.addf %15, %20 : vector<4x128xf32>
    %c4_i32 = arith.constant 4 : i32
    %22 = tpu.dynamic_rotate %21 by %c4_i32 dim 1 : vector<4x128xf32>, i32 -> vector<4x128xf32>
    %c4_i32_10 = arith.constant 4 : i32
    %23 = vector.broadcast %c4_i32_10 : i32 to vector<4x128xi32>
    %24 = arith.cmpi sge, %9, %23 : vector<4x128xi32>
    %cst_11 = arith.constant 0.000000e+00 : f32
    %25 = vector.broadcast %cst_11 : f32 to vector<4x128xf32>
    %26 = arith.select %24, %22, %25 : vector<4x128xi1>, vector<4x128xf32>
    %27 = arith.addf %21, %26 : vector<4x128xf32>
    %c8_i32 = arith.constant 8 : i32
    %28 = tpu.dynamic_rotate %27 by %c8_i32 dim 1 : vector<4x128xf32>, i32 -> vector<4x128xf32>
    %c8_i32_12 = arith.constant 8 : i32
    %29 = vector.broadcast %c8_i32_12 : i32 to vector<4x128xi32>
    %30 = arith.cmpi sge, %9, %29 : vector<4x128xi32>
    %cst_13 = arith.constant 0.000000e+00 : f32
    %31 = vector.broadcast %cst_13 : f32 to vector<4x128xf32>
    %32 = arith.select %30, %28, %31 : vector<4x128xi1>, vector<4x128xf32>
    %33 = arith.addf %27, %32 : vector<4x128xf32>
    %c16_i32 = arith.constant 16 : i32
    %34 = tpu.dynamic_rotate %33 by %c16_i32 dim 1 : vector<4x128xf32>, i32 -> vector<4x128xf32>
    %c16_i32_14 = arith.constant 16 : i32
    %35 = vector.broadcast %c16_i32_14 : i32 to vector<4x128xi32>
    %36 = arith.cmpi sge, %9, %35 : vector<4x128xi32>
    %cst_15 = arith.constant 0.000000e+00 : f32
    %37 = vector.broadcast %cst_15 : f32 to vector<4x128xf32>
    %38 = arith.select %36, %34, %37 : vector<4x128xi1>, vector<4x128xf32>
    %39 = arith.addf %33, %38 : vector<4x128xf32>
    %c32_i32 = arith.constant 32 : i32
    %40 = tpu.dynamic_rotate %39 by %c32_i32 dim 1 : vector<4x128xf32>, i32 -> vector<4x128xf32>
    %c32_i32_16 = arith.constant 32 : i32
    %41 = vector.broadcast %c32_i32_16 : i32 to vector<4x128xi32>
    %42 = arith.cmpi sge, %9, %41 : vector<4x128xi32>
    %cst_17 = arith.constant 0.000000e+00 : f32
    %43 = vector.broadcast %cst_17 : f32 to vector<4x128xf32>
    %44 = arith.select %42, %40, %43 : vector<4x128xi1>, vector<4x128xf32>
    %45 = arith.addf %39, %44 : vector<4x128xf32>
    %c64_i32 = arith.constant 64 : i32
    %46 = tpu.dynamic_rotate %45 by %c64_i32 dim 1 : vector<4x128xf32>, i32 -> vector<4x128xf32>
    %c64_i32_18 = arith.constant 64 : i32
    %47 = vector.broadcast %c64_i32_18 : i32 to vector<4x128xi32>
    %48 = arith.cmpi sge, %9, %47 : vector<4x128xi32>
    %cst_19 = arith.constant 0.000000e+00 : f32
    %49 = vector.broadcast %cst_19 : f32 to vector<4x128xf32>
    %50 = arith.select %48, %46, %49 : vector<4x128xi1>, vector<4x128xf32>
    %51 = arith.addf %45, %50 : vector<4x128xf32>
    %c0_20 = arith.constant 0 : index
    %c0_21 = arith.constant 0 : index
    %52 = vector.load %arg5[%c0_20, %c0_21] : memref<4x1xf32, #tpu.memory_space<vmem>>, vector<4x1xf32>
    %53 = vector.broadcast %52 : vector<4x1xf32> to vector<4x128xf32>
    %54 = arith.addf %51, %53 : vector<4x128xf32>
    %c128_i32 = arith.constant 128 : i32
    %55 = arith.muli %arg0, %c128_i32 : i32
    %56 = vector.broadcast %55 : i32 to vector<4x128xi32>
    %57 = arith.addi %9, %56 : vector<4x128xi32>
    %c1_i32_22 = arith.constant 1 : i32
    %58 = vector.broadcast %c1_i32_22 : i32 to vector<4x128xi32>
    %59 = arith.addi %57, %58 : vector<4x128xi32>
    %60 = arith.sitofp %59 : vector<4x128xi32> to vector<4x128xf32>
    %61 = arith.subf %60, %54 : vector<4x128xf32>
    %62 = vector.broadcast %8 : vector<4x1xf32> to vector<4x128xf32>
    %63 = arith.addf %62, %61 : vector<4x128xf32>
    %64 = arith.divf %60, %63 : vector<4x128xf32>
    %c1_i32_23 = arith.constant 1 : i32
    %65 = tpu.dynamic_rotate %64 by %c1_i32_23 dim 1 : vector<4x128xf32>, i32 -> vector<4x128xf32>
    %c0_i32_24 = arith.constant 0 : i32
    %66 = vector.broadcast %c0_i32_24 : i32 to vector<4x128xi32>
    %67 = arith.cmpi eq, %9, %66 : vector<4x128xi32>
    %c0_25 = arith.constant 0 : index
    %c0_26 = arith.constant 0 : index
    %68 = vector.load %arg6[%c0_25, %c0_26] : memref<4x1xf32, #tpu.memory_space<vmem>>, vector<4x1xf32>
    %69 = vector.shape_cast %68 : vector<4x1xf32> to vector<4x1xf32>
    %70 = vector.broadcast %69 : vector<4x1xf32> to vector<4x128xf32>
    %71 = arith.select %67, %70, %65 : vector<4x128xi1>, vector<4x128xf32>
    %72 = arith.subf %64, %71 : vector<4x128xf32>
    %c0_27 = arith.constant 0 : index
    %c0_28 = arith.constant 0 : index
    %73 = vector.load %arg7[%c0_27, %c0_28] : memref<4x1xf32, #tpu.memory_space<vmem>>, vector<4x1xf32>
    %74 = arith.mulf %5, %72 : vector<4x128xf32>
    %cst_29 = arith.constant dense<0.000000e+00> : vector<4xf32>
    %75 = vector.multi_reduction <add>, %74, %cst_29 [1] : vector<4x128xf32> to vector<4xf32>
    %76 = vector.shape_cast %75 : vector<4xf32> to vector<4x1xf32>
    %77 = arith.addf %73, %76 : vector<4x1xf32>
    %c0_30 = arith.constant 0 : index
    %c0_31 = arith.constant 0 : index
    %78 = vector.load %arg7[%c0_30, %c0_31] : memref<4x1xf32, #tpu.memory_space<vmem>>, vector<4x1xf32>
    tpu.vector_store %arg7[%c0_30, %c0_31], %77 {strides = array<i32>} : memref<4x1xf32, #tpu.memory_space<vmem>>, vector<4x1xf32>,
    %79 = vector.extract_strided_slice %54 {offsets = [0, 127], sizes = [4, 1], strides = [1, 1]} : vector<4x128xf32> to vector<4x1xf32>
    %c0_32 = arith.constant 0 : index
    %c0_33 = arith.constant 0 : index
    %80 = vector.load %arg5[%c0_32, %c0_33] : memref<4x1xf32, #tpu.memory_space<vmem>>, vector<4x1xf32>
    tpu.vector_store %arg5[%c0_32, %c0_33], %79 {strides = array<i32>} : memref<4x1xf32, #tpu.memory_space<vmem>>, vector<4x1xf32>,
    %81 = vector.extract_strided_slice %64 {offsets = [0, 127], sizes = [4, 1], strides = [1, 1]} : vector<4x128xf32> to vector<4x1xf32>
    %c0_34 = arith.constant 0 : index
    %c0_35 = arith.constant 0 : index
    %82 = vector.load %arg6[%c0_34, %c0_35] : memref<4x1xf32, #tpu.memory_space<vmem>>, vector<4x1xf32>
    tpu.vector_store %arg6[%c0_34, %c0_35], %81 {strides = array<i32>} : memref<4x1xf32, #tpu.memory_space<vmem>>, vector<4x1xf32>,
    %c3_i32 = arith.constant 3 : i32
    %83 = arith.cmpi eq, %arg0, %c3_i32 : i32
    %84 = arith.extui %83 : i1 to i32
    %c0_i32_36 = arith.constant 0 : i32
    %85 = arith.cmpi ne, %84, %c0_i32_36 : i32
    scf.if %85 {
      %cst_37 = arith.constant 0.000000e+00 : f32
      %86 = vector.broadcast %cst_37 : f32 to vector<4x1xf32>
      %87 = arith.cmpf ogt, %8, %86 : vector<4x1xf32>
      %88 = arith.extui %87 : vector<4x1xi1> to vector<4x1xi32>
      %89 = arith.sitofp %88 : vector<4x1xi32> to vector<4x1xf32>
      %c0_38 = arith.constant 0 : index
      %c0_39 = arith.constant 0 : index
      %90 = vector.load %arg7[%c0_38, %c0_39] : memref<4x1xf32, #tpu.memory_space<vmem>>, vector<4x1xf32>
      %91 = arith.mulf %89, %90 : vector<4x1xf32>
      %92 = vector.shape_cast %91 : vector<4x1xf32> to vector<1x4x1xf32>
      %cst_40 = arith.constant dense<0.000000e+00> : vector<1xf32>
      %93 = vector.multi_reduction <add>, %92, %cst_40 [1, 2] : vector<1x4x1xf32> to vector<1xf32>
      %94 = vector.shape_cast %93 : vector<1xf32> to vector<1x1x1xf32>
      %95 = vector.extract %94[0, 0, 0] : f32 from vector<1x1x1xf32>
      %96 = vector.broadcast %95 : f32 to vector<1x1xf32>
      %97 = vector.shape_cast %89 : vector<4x1xf32> to vector<1x4x1xf32>
      %cst_41 = arith.constant dense<0.000000e+00> : vector<1xf32>
      %98 = vector.multi_reduction <add>, %97, %cst_41 [1, 2] : vector<1x4x1xf32> to vector<1xf32>
      %99 = vector.shape_cast %98 : vector<1xf32> to vector<1x1x1xf32>
      %100 = vector.extract %99[0, 0, 0] : f32 from vector<1x1x1xf32>
      %101 = vector.broadcast %100 : f32 to vector<1x1xf32>
      %cst_42 = arith.constant 0.000000e+00 : f32
      %102 = vector.broadcast %cst_42 : f32 to vector<1x1xf32>
      %103 = arith.cmpf ogt, %101, %102 : vector<1x1xf32>
      %104 = arith.divf %96, %101 : vector<1x1xf32>
      %cst_43 = arith.constant 0.000000e+00 : f32
      %105 = vector.broadcast %cst_43 : f32 to vector<1x1xf32>
      %106 = arith.select %103, %104, %105 : vector<1x1xi1>, vector<1x1xf32>
      %c0_44 = arith.constant 0 : index
      %c0_45 = arith.constant 0 : index
      %107 = vector.load %arg4[%c0_44, %c0_45] : memref<1x1xf32, #tpu.memory_space<vmem>>, vector<1x1xf32>
      tpu.vector_store %arg4[%c0_44, %c0_45], %106 {strides = array<i32>} : memref<1x1xf32, #tpu.memory_space<vmem>>, vector<1x1xf32>,
    } else {
    }
    return
  }
  func.func @transform_0(%arg0: i32) -> (i32, i32) {
    %c0_i32 = arith.constant 0 : i32
    %c0_i32_0 = arith.constant 0 : i32
    return %c0_i32, %arg0 : i32, i32
  }
  func.func @transform_1(%arg0: i32) -> (i32, i32) {
    %c0_i32 = arith.constant 0 : i32
    %c0_i32_0 = arith.constant 0 : i32
    return %c0_i32, %arg0 : i32, i32
  }
  func.func @transform_2(%arg0: i32) -> (i32, i32) {
    %c0_i32 = arith.constant 0 : i32
    %c0_i32_0 = arith.constant 0 : i32
    %c0_i32_1 = arith.constant 0 : i32
    return %c0_i32, %c0_i32_0 : i32, i32
  }
  func.func @transform_3(%arg0: i32) -> (i32, i32) {
    %c0_i32 = arith.constant 0 : i32
    %c0_i32_0 = arith.constant 0 : i32
    %c0_i32_1 = arith.constant 0 : i32
    return %c0_i32, %c0_i32_0 : i32, i32
  }
}

</mosaic_0001>

<bundles_post_ra>
// kernel: eq.12
= control target key start
LH: loop header
LB: loop body
LE: loop exit
PB: predicated region body
PF: predicated region fallthrough
CT: control target
= control target key end

     0   :  { %s69_s8 = smov 112   ;;  %s70_s11 = smov 80   ;;  %vm3_vm0 = vcmask 130048   ;;  %vm9_vm1 = vcmask 1048448   ;;  %vm15_vm2 = vcmask 917248   ;;  %vm21_vm3 = vcmask 786048   ;;  %s113_s0 = inlined_call_operand.vmem [shape: s32[2,16,16], index: 0, kind: input, shape index: {}]   ;;  %s114_s1 = inlined_call_operand.vmem [shape: s32[512], index: 1, kind: output, shape index: {}]  }
   0x1   :  { %v55_v0 = vld [vmem:[%s113_s0 + $0x7] ss:$8 sm:$0xf]   ;;  %v57_v1 = vld [vmem:[%s113_s0 + $0x5] ss:$8 sm:$0xf]  }
   0x2   :  { %7 = vrot.lane.b32.xlu0 %v55_v0, %s69_s8  ;;  %19 = vrot.lane.b32.xlu1 %v57_v1, %s70_s11  ;;  %v56_v2 = vld [vmem:[%s113_s0 + $0x6] ss:$8 sm:$0xf]   ;;  %v58_v3 = vld [vmem:[%s113_s0 + $0x4] ss:$8 sm:$0xf]  }
   0x3   :  { %s71_s16 = smov 96   ;;  %v2_v4 = vld [vmem:[%s113_s0] ss:$8 sm:$0xf]   ;;  %s72_s19 = smov 64   ;;  %vm27_vm4 = vcmask 654848  }
   0x4   :  { %v59_v5 = vld [vmem:[%s113_s0 + $0x3] ss:$8 sm:$0xf]   ;;  %4 = vst.msk [vmem:[#allocation0] sm:$0xf] %vm3_vm0, %v2_v4   ;;  %s73_s24 = smov 48  }
   0x5   :  { %v60_v6 = vld [vmem:[%s113_s0 + $0x2] ss:$8 sm:$0xf]   ;;  %s74_s25 = smov 32   ;;  %vm33_vm5 = vcmask 523648   ;;  %vm39_vm6 = vcmask 392448  }
   0x6   :  { %13 = vrot.lane.b32.xlu0 %v56_v2, %s71_s16  ;;  %25 = vrot.lane.b32.xlu1 %v58_v3, %s72_s19  ;;  %v61_v7 = vld [vmem:[%s113_s0 + $0x1] ss:$8 sm:$0xf]   ;;  %s75_s0 = smov 16   ;;  %vm45_vm7 = vcmask 261248  }
   0xa   :  { %31 = vrot.lane.b32.xlu0 %v59_v5, %s73_s24  ;;  %37 = vrot.lane.b32.xlu1 %v60_v6, %s74_s25 }
   0xe   :  { %43 = vrot.lane.b32.xlu0 %v61_v7, %s75_s0 }
  0x74   :  { %v8_v8 = vpop.permute.xlu0 %7   ;;  %v20_v9 = vpop.permute.xlu1 %19  }
  0x75   :  { %10 = vst.msk [vmem:[#allocation0] sm:$0xf] %vm9_vm1, %v8_v8  }
  0x78   :  { %v14_v10 = vpop.permute.xlu0 %13   ;;  %v26_v11 = vpop.permute.xlu1 %25  }
  0x79   :  { %16 = vst.msk [vmem:[#allocation0] sm:$0xf] %vm15_vm2, %v14_v10  }
  0x7a   :  { %22 = vst.msk [vmem:[#allocation0] sm:$0xf] %vm21_vm3, %v20_v9  }
  0x7b   :  { %28 = vst.msk [vmem:[#allocation0] sm:$0xf] %vm27_vm4, %v26_v11  }
  0x7c   :  { %v32_v12 = vpop.permute.xlu0 %31   ;;  %v38_v13 = vpop.permute.xlu1 %37  }
  0x7d   :  { %34 = vst.msk [vmem:[#allocation0] sm:$0xf] %vm33_vm5, %v32_v12  }
  0x7e   :  { %40 = vst.msk [vmem:[#allocation0] sm:$0xf] %vm39_vm6, %v38_v13  }
  0x80   :  { %v44_v14 = vpop.permute.xlu0 %43  }
  0x81   :  { %46 = vst.msk [vmem:[#allocation0] sm:$0xf] %vm45_vm7, %v44_v14  }
  0x88   :  { %v51_v15 = vld [vmem:[#allocation0] sm:$0xf] }
  0x89   :  { %54 = vst [vmem:[%s114_s1] sm:$0xf] %v51_v15 }

// kernel: lovasz_softmax_loss.2
= control target key start
LH: loop header
LB: loop body
LE: loop exit
PB: predicated region body
PF: predicated region fallthrough
CT: control target
= control target key end

     0   :  { %s384_s12 = smov 0   ;;  %s420_s0 = inlined_call_operand.vmem [shape: f32[4,512], index: 0, kind: input, shape index: {}]   ;;  %s421_s1 = inlined_call_operand.vmem [shape: s32[1,512], index: 1, kind: input, shape index: {}]   ;;  %s422_s2 = inlined_call_operand.vmem [shape: f32[4,512], index: 2, kind: output, shape index: {0}]   ;;  %s423_s3 = inlined_call_operand.vmem [shape: bf16[4,512], index: 3, kind: output, shape index: {1}]  }
   0x1 LB: > { %s330_s13 = sadd.s32 4294967295, %s360_s12   ;;  %p334_p0 = scmp.ge.s32.totalorder %s360_s12, 1  ;;  %s360_s12 = sphi %s384_s12, %s14_s12  }
   0x2   : > { %p147_p1 = scmp.lt.s32.totalorder %s360_s12, 5 }
   0x4   : > { %p148_p2 = pnand %p334_p0, %p147_p1 }
   0x5   : > { %p176_p3 = scmp.lt.s32.totalorder (!%p148_p2), %s330_s13, 3 }
   0x6   : > { %151 = sbr.rel (%p148_p2) target bundleno = 83 (0x53), region = 28 }
   0xb   : > { %v215_v0 = vlaneseq  ;;  %s425_s13 = smov (!%p176_p3, %s330_s13), 3  ;;  %vm192_vm0 = vcmask 1043456   ;;  %v362_v7 = vmov 0   ;;  %v363_v13 = vmov 0.0  }
   0xc   : > { %s335_s14 = sshll.u32 %s425_s13, 2  ;;  %s182_s17 = scalar_lea.vmem %s421_s1, %s425_s13 }
   0xd   : > { %v216_v1 = vshrl.u32 %v215_v0, 7  ;;  %s179_s20 = scalar_lea.vmem %s420_s0, %s335_s14  ;;  %v213_v3 = vld [vmem:[%s182_s17] sm:$0x1]  ;;  %s337_s21 = sshll.u32 %s425_s13, 1 }
   0xe   : > { %v191_v4 = vld [vmem:[%s179_s20] sm:$0xf]  ;;  %vm214_vm1 = vcmp.ne.s32.totalorder %v213_v3, 255  ;;  %s190_s24 = scalar_lea.vmem %s423_s3, %s337_s21  ;;  %s186_s27 = scalar_lea.vmem %s422_s2, %s335_s14 }
   0xf   : > { %v219_v2 = vsub.s32 0, %v216_v1  ;;  %v193_v6 = vsel %vm192_vm0, %v191_v4, -inf  ;;  %v222_v8 = vsel %vm214_vm1, 1, %v362_v7 }
  0x10   : > { %v194_v9 = vrot.slane %v193_v6, 4 }
  0x11   : > { %v220_v5 = vrot.slane %v213_v3, %v219_v2  ;;  %v226_v10 = vrot.slane %v222_v8, %v219_v2 }
  0x12   : > { %v195_v11 = vmax.f32 %v193_v6, %v194_v9 }
  0x13   : > { %vm221_vm2 = vcmp.eq.s32.totalorder %v220_v5, %v216_v1  ;;  %vm227_vm3 = vcmp.eq.s32.totalorder %v226_v10, 1 }
  0x14   : > { %vm228_vm4 = vmand %vm221_vm2, %vm227_vm3  ;;  %v196_v12 = vrot.slane %v195_v11, 2 }
  0x15   : > { %v229_v14 = vsel %vm228_vm4, 1.0, %v363_v13 }
  0x16   : > { %v235_v15 = vpack.c.bf16 %v229_v14, %v229_v14  ;;  %v197_v16 = vmax.f32 %v195_v11, %v196_v12 }
  0x18   : > { %236 = vst [vmem:[%s190_s24] sm:$0x3] %v235_v15  ;;  %v198_v17 = vrot.slane %v197_v16, 1 }
  0x1a   : > { %v199_v18 = vmax.f32 %v197_v16, %v198_v17 }
  0x1c   : > { %v200_v19 = vsub.f32 %v191_v4, %v199_v18 }
  0x1e   : > { %v201_v20 = vmul.f32 1.442695, %v200_v19 }
  0x20   : > { %350 = vpow2.f32 %v201_v20 }
  0x2d   : > { %v351_v21 = vpop.eup %350 }
  0x2e   : > { %v203_v22 = vsel %vm192_vm0, %v351_v21, 0.0 }
  0x2f   : > { %v204_v23 = vrot.slane %v203_v22, 4 }
  0x31   : > { %v205_v24 = vadd.f32 %v204_v23, %v203_v22 }
  0x33   : > { %v206_v25 = vrot.slane %v205_v24, 2 }
  0x35   : > { %v207_v26 = vadd.f32 %v206_v25, %v205_v24 }
  0x37   : > { %v208_v27 = vrot.slane %v207_v26, 1 }
  0x39   : > { %v209_v28 = vadd.f32 %v208_v27, %v207_v26 }
  0x3b   : > { %352 = vrcp.f32 %v209_v28 }
  0x48   : > { %v353_v29 = vpop.eup %352 }
  0x49   : > { %v212_v30 = vmul.f32 %v353_v29, %v351_v21 }
  0x4b   : > { %v230_v31 = vsub.f32 %v229_v14, %v212_v30 }
  0x4d   : > { %v231_v32 = vand.u32 2147483647, %v230_v31 }
  0x4f   : > { %v232_v33 = vsub.f32 0.0, %v231_v32 }
  0x51   : > { %v233_v34 = vsel %vm227_vm3, %v232_v33, 0.0 }
  0x52   : > { %234 = vst [vmem:[%s186_s27] sm:$0xf] %v233_v34 }
  0x53 PF: > { %s14_s12 = sadd.s32 1, %s360_s12  }
  0x54   : > { %p11_p4 = scmp.ge.s32.totalorder %s14_s12, 6  }
  0x56   :  { %13 = sbr.rel (!%p11_p4) target bundleno = 1 (0x1), region = 73 }

// kernel: lovasz_softmax_loss.3
= control target key start
LH: loop header
LB: loop body
LE: loop exit
PB: predicated region body
PF: predicated region fallthrough
CT: control target
= control target key end

     0   :  { %8 = vsyncpa [#allocation6], 0  ;;  %s483_s12 = smov 0   ;;  %s545_s0 = inlined_call_operand.vmem [shape: f32[4,512], index: 0, kind: input, shape index: {}]   ;;  %s546_s1 = inlined_call_operand.vmem [shape: bf16[4,512], index: 1, kind: input, shape index: {}]   ;;  %s547_s2 = inlined_call_operand.vmem [shape: f32[4,1], index: 2, kind: input, shape index: {}]   ;;  %s548_s3 = inlined_call_operand.hbm [shape: f32[1,1], index: 3, kind: output, shape index: {}]  }
   0x1 LB: > { %s489_s13 = sadd.s32 4294967295, %s450_s12   ;;  %p370_p0 = scmp.ge.s32.totalorder %s450_s12, 1  ;;  %s450_s12 = sphi %s483_s12, %s14_s12  }
   0x2   : > { %p141_p1 = scmp.lt.s32.totalorder %s450_s12, 5 }
   0x4   : > { %p142_p2 = pnand %p370_p0, %p141_p1 }
   0x5   : > { %p163_p3 = scmp.lt.s32.totalorder (!%p142_p2), %s489_s13, 3  ;;  %p373_p4 = scmp.ne.s32.totalorder (!%p142_p2), %s489_s13, 0 }
   0x6   : > { %145 = sbr.rel (%p142_p2) target bundleno = 1387 (0x56b), region = 32 }
   0xb   : > { %s164_s14 = scalar_select %p163_p3, %s489_s13, 3 }
   0xc   : > { %174 = sbr.rel (%p373_p4) target bundleno = 20 (0x14), region = 36 }
   0xd   : > { %s371_s15 = sshll.u32 %s164_s14, 2  ;;  %s372_s16 = sshll.u32 %s164_s14, 1 }
   0xe   : > { %s498_s19 = scalar_lea.vmem %s545_s0, %s371_s15  ;;  %s170_s22 = scalar_lea.vmem %s546_s1, %s372_s16 }
  0x11   : > { %vm175_vm0 = vcmask 3072   ;;  %v452_v0 = vmov 0.0  }
  0x12   : > { %176 = vst.msk [vmem:[#allocation2] sm:$0xf] %vm175_vm0, %v452_v0  ;;  %177 = vst.msk [vmem:[#allocation3] sm:$0xf] %vm175_vm0, %v452_v0 }
  0x13   : > { %178 = vst.msk [vmem:[#allocation4] sm:$0xf] %vm175_vm0, %v452_v0 }
  0x14 PF: > { %v181_v1 = vld [vmem:[%s170_s22] sm:$0x3]  ;;  %s453_s23 = smov 1   ;;  %v184_v3 = vlaneseq  ;;  %s454_s24 = smov 2   ;;  %v457_v14 = vmov 0   ;;  %vm260_vm9 = vcmask 3072  }
  0x15   : > { %v182_v2 = vunpack.c.l.bf16 %v181_v1  ;;  %s455_s25 = smov 4   ;;  %s456_s26 = smov 8   ;;  %410 = vset.pattern.permute.xlu0 %v457_v14  ;;  %411 = vset.pattern.permute.xlu1 %v457_v14  ;;  %v183_v26 = vld [vmem:[%s547_s2] sm:$0xf]  ;;  %vm255_vm10 = vcmask 1043456  }
  0x16   : > { %v505_v4 = vand.u32 127, %v184_v3  ;;  %s458_s27 = smov 16   ;;  %s459_s28 = smov 32   ;;  %v179_v41 = vld [vmem:[%s498_s19] sm:$0xf] }
  0x17   : > { %186 = vrot.lane.b32.xlu0 %v182_v2, %s453_s23  ;;  %s460_s29 = smov 64   ;;  %s374_s5 = sshll.u32 %s489_s13, 7  ;;  %v180_v44 = vsub.f32 0.0, %v179_v41 }
  0x18   : > { %vm188_vm1 = vcmp.ge.s32.totalorder %v505_v4, 1  ;;  %vm193_vm2 = vcmp.ge.s32.totalorder %v505_v4, 2  ;;  %vm198_vm3 = vcmp.ge.s32.totalorder %v505_v4, 4  ;;  %vm203_vm4 = vcmp.ge.s32.totalorder %v505_v4, 8  ;;  %p375_p5 = scmp.ne.s32.totalorder %s489_s13, 3 }
  0x19   : > { %v221_v18 = vld [vmem:[#allocation2] sm:$0xf]  ;;  %v245_v19 = vld [vmem:[#allocation3] sm:$0xf]  ;;  %vm208_vm5 = vcmp.ge.s32.totalorder %v505_v4, 16  ;;  %vm213_vm6 = vcmp.ge.s32.totalorder %v505_v4, 32  ;;  %v229_v27 = vstv %s374_s5 }
  0x1a   : > { %vm218_vm7 = vcmp.ge.s32.totalorder %v505_v4, 64  ;;  %v230_v29 = vadd.s32 %v229_v27, %v505_v4  ;;  %vm244_vm8 = vcmp.eq.s32.totalorder %v505_v4, 0  ;;  %v253_v51 = vld [vmem:[#allocation4] sm:$0xf] }
  0x1c   : > { %v231_v32 = vadd.s32 1, %v230_v29 }
  0x1e   : > { %v232_v35 = vcvt.s32.f32 %v231_v32 }
  0x89   : > { %v187_v5 = vpop.permute.xlu0 %186 }
  0x8a   : > { %v189_v6 = vsel %vm188_vm1, %v187_v5, 0.0 }
  0x8b   : > { %v190_v7 = vadd.f32 %v189_v6, %v182_v2 }
  0x8d   : > { %191 = vrot.lane.b32.xlu0 %v190_v7, %s454_s24 }
  0xff   : > { %v192_v8 = vpop.permute.xlu0 %191 }
 0x100   : > { %v194_v9 = vsel %vm193_vm2, %v192_v8, 0.0 }
 0x101   : > { %v195_v10 = vadd.f32 %v194_v9, %v190_v7 }
 0x103   : > { %196 = vrot.lane.b32.xlu1 %v195_v10, %s455_s25 }
 0x175   : > { %v197_v11 = vpop.permute.xlu1 %196 }
 0x176   : > { %v199_v12 = vsel %vm198_vm3, %v197_v11, 0.0 }
 0x177   : > { %v200_v13 = vadd.f32 %v199_v12, %v195_v10 }
 0x179   : > { %201 = vrot.lane.b32.xlu1 %v200_v13, %s456_s26 }
 0x1eb   : > { %v202_v15 = vpop.permute.xlu1 %201 }
 0x1ec   : > { %v204_v16 = vsel %vm203_vm4, %v202_v15, 0.0 }
 0x1ed   : > { %v205_v17 = vadd.f32 %v204_v16, %v200_v13 }
 0x1ef   : > { %206 = vrot.lane.b32.xlu0 %v205_v17, %s458_s27 }
 0x1f3   : > { %224 = vperm.xlu0 %410, %v221_v18  }
 0x1f7   : > { %248 = vperm.xlu0 %410, %v245_v19  }
 0x261   : > { %v207_v20 = vpop.permute.xlu0 %206 }
 0x262   : > { %v209_v21 = vsel %vm208_vm5, %v207_v20, 0.0 }
 0x263   : > { %v210_v22 = vadd.f32 %v209_v21, %v205_v17 }
 0x265   : > { %211 = vrot.lane.b32.xlu1 %v210_v22, %s459_s28 }
 0x26e   : > { %v225_v33 = vpop.permute.xlu0 %224 }
 0x272   : > { %v249_v42 = vpop.permute.xlu0 %248 }
 0x2d7   : > { %v212_v23 = vpop.permute.xlu1 %211 }
 0x2d8   : > { %v214_v24 = vsel %vm213_vm6, %v212_v23, 0.0 }
 0x2d9   : > { %v215_v25 = vadd.f32 %v214_v24, %v210_v22 }
 0x2db   : > { %216 = vrot.lane.b32.xlu1 %v215_v25, %s460_s29 }
 0x2df   : > { %236 = vperm.xlu1 %411, %v183_v26  }
 0x34d   : > { %v217_v28 = vpop.permute.xlu1 %216 }
 0x34e   : > { %v219_v30 = vsel %vm218_vm7, %v217_v28, 0.0 }
 0x34f   : > { %v220_v31 = vadd.f32 %v219_v30, %v215_v25 }
 0x351   : > { %v227_v34 = vadd.f32 %v225_v33, %v220_v31 }
 0x353   : > { %v233_v36 = vsub.f32 %v232_v35, %v227_v34 }
 0x35a   : > { %v237_v37 = vpop.permute.xlu1 %236 }
 0x35b   : > { %v239_v38 = vadd.f32 %v237_v37, %v233_v36 }
 0x35d   : > { %412 = vrcp.f32 %v239_v38 }
 0x36a   : > { %v413_v39 = vpop.eup %412 }
 0x36b   : > { %v241_v40 = vmul.f32 %v413_v39, %v232_v35 }
 0x36d   : > { %242 = vrot.lane.b32.xlu1 %v241_v40, %s453_s23 }
 0x371   : > { %263 = vrot.lane.b32.xlu1 %v227_v34, %s453_s23 }
 0x375   : > { %268 = vrot.lane.b32.xlu1 %v241_v40, %s453_s23 }
 0x3df   : > { %v243_v43 = vpop.permute.xlu1 %242 }
 0x3e0   : > { %v251_v45 = vsel %vm244_vm8, %v249_v42, %v243_v43 }
 0x3e1   : > { %v252_v46 = vsub.f32 %v241_v40, %v251_v45 }
 0x3e3   : > { %v264_v47 = vpop.permute.xlu1 %263  ;;  %v254_v48 = vmul.f32 %v252_v46, %v180_v44 }
 0x3e4   : > { %266 = vst.msk [vmem:[#allocation2] sm:$0xf] %vm260_vm9, %v264_v47 }
 0x3e5   : > { %v256_v49 = vsel %vm255_vm10, %v254_v48, 0.0 }
 0x3e6   : > { %257 = vadd.xlane.f32.xlu0 %v256_v49 }
 0x3e7   : > { %v269_v50 = vpop.permute.xlu1 %268 }
 0x3e8   : > { %271 = vst.msk [vmem:[#allocation3] sm:$0xf] %vm260_vm9, %v269_v50 }
 0x46e   : > { %275 = sbr.rel (%p375_p5) target bundleno = 1372 (0x55c), region = 40 }
 0x46f   : > { %v258_v52 = vpop.xlane.xlu0 %257 }
 0x470   : > { %v259_v53 = vadd.f32 %v258_v52, %v253_v51 }
 0x472   : > { %261 = vst.msk [vmem:[#allocation4] sm:$0xf] %vm260_vm9, %v259_v53 }
 0x473   : > { %vm276_vm11 = vcmp.gt.f32.partialorder %v183_v26, 0.0  ;;  %v461_v55 = vmov 0.0   ;;  %vm307_vm12 = vcmask 0  }
 0x474   : > { %v376_v56 = vsel %vm276_vm11, 1.0, %v461_v55 }
 0x475   : > { %v292_v59 = vsel %vm260_vm9, %v376_v56, 0.0 }
 0x479   : > { %v279_v54 = vld [vmem:[#allocation4] sm:$0xf] }
 0x47a   : > { %v280_v57 = vmul.f32 %v376_v56, %v279_v54 }
 0x47c   : > { %v281_v58 = vsel %vm260_vm9, %v280_v57, 0.0 }
 0x47d   : > { %282 = vadd.xlane.f32.xlu0 %v281_v58 }
 0x481   : > { %293 = vadd.xlane.f32.xlu0 %v292_v59 }
 0x506   : > { %v283_v60 = vpop.xlane.xlu0 %282 }
 0x507   : > { %v284_v61 = vrot.slane %v283_v60, 4 }
 0x509   : > { %v285_v62 = vadd.f32 %v284_v61, %v283_v60 }
 0x50a   : > { %v294_v63 = vpop.xlane.xlu0 %293 }
 0x50b   : > { %v286_v0 = vrot.slane %v285_v62, 2  ;;  %v295_v1 = vrot.slane %v294_v63, 4 }
 0x50d   : > { %v296_v2 = vadd.f32 %v295_v1, %v294_v63  ;;  %v287_v3 = vadd.f32 %v286_v0, %v285_v62 }
 0x50f   : > { %v297_v4 = vrot.slane %v296_v2, 2  ;;  %v288_v5 = vrot.slane %v287_v3, 1 }
 0x511   : > { %v298_v6 = vadd.f32 %v297_v4, %v296_v2  ;;  %v289_v7 = vadd.f32 %v288_v5, %v287_v3 }
 0x513   : > { %381 = vpush %v289_v7  ;;  %v299_v8 = vrot.slane %v298_v6, 1 }
 0x515   : > { %v300_v9 = vadd.f32 %v299_v8, %v298_v6 }
 0x517   : > { %383 = vpush %v300_v9 }
 0x544   : > { %s382_s6 = spop %381 }
 0x545   : > { %v291_v12 = vstv %s382_s6 }
 0x548   : > { %s384_s7 = spop %383 }
 0x549   : > { %v302_v10 = vstv %s384_s7 }
 0x54a   : > { %414 = vrcp.f32 %v302_v10  ;;  %vm303_vm13 = vcmp.gt.f32.partialorder %v302_v10, 0.0 }
 0x557   : > { %v415_v11 = vpop.eup %414 }
 0x558   : > { %v305_v13 = vmul.f32 %v415_v11, %v291_v12 }
 0x55a   : > { %v306_v14 = vsel %vm303_vm13, %v305_v13, 0.0 }
 0x55b   : > { %308 = vst.msk [vmem:[#allocation5] sm:$0x1] %vm307_vm12, %v306_v14 }
 0x55c PF: > { %p389_p6 = scmp.eq.s32.totalorder %s489_s13, 3  ;;  %s462_s8 = smov [#allocation5]  }
 0x55d   : > { %s316_s9 = sshll.u32 %s462_s8, 4  ;;  %s317_s9 = int_to_ptr.vmem [resolvable:$true] %s316_s9 }
 0x55e   : > { %s416_s10 = scalar_lea.vmem %s317_s9, 16  ;;  %s422_s11 = scalar_lea.vmem %s317_s9, 32 }
 0x55f   : > { %p417_p7 = scmp.ne.s32.totalorder %s317_s9, %s416_s10  ;;  %p423_p10 = scmp.lt.s32.totalorder %s317_s9, %s317_s9 }
 0x560   : > { %p424_p11 = scmp.lt.s32.totalorder %s422_s11, %s416_s10 }
 0x561   : > { %p418_p8 = pnand %p417_p7, %p389_p6 }
 0x562   : > { %p425_p12 = por %p424_p11, %p423_p10 }
 0x563   : > { %p419_p9 = pneg %p418_p8 }
 0x565   : > { %p426_p13 = pnand %p425_p12, %p419_p9 }
 0x567   : > { %429 = shalt.err (!%p426_p13)
}
 0x568   : > { %386 = dma.vmem_to_hbm [thread:$0]  (%p389_p6), %s317_s9, 16, %s548_s3, [#allocation6]  }
 0x569   : > { %445 = dma.done.wait (%p389_p6), [#allocation6], 16  }
 0x56a   : > { %447 = vsyncadd (%p389_p6), [#allocation6], 4294967280 }
 0x56b PF: > { %s14_s12 = sadd.s32 1, %s450_s12  }
 0x56c   : > { %p11_p0 = scmp.ge.s32.totalorder %s14_s12, 6  }
 0x56e   :  { %13 = sbr.rel (!%p11_p0) target bundleno = 1 (0x1), region = 70 }
 0x573   :  { %329 = vsyncpa [#allocation6], 1 }
 0x574   :  { %331 = vsyncpa [#allocation6 + $0x1], 1 }

</bundles_post_ra>
